<compile_context>
chip_gen: v7x
topology: tpu7x:2x2x1
jax: 0.10.0
libtpu: 0.0.40
codegen_flags: <defaults>
</compile_context>

<pallas_src>
import functools

import jax
import jax.numpy as jnp
from jax.experimental import pallas as pl
from jax.experimental.pallas import tpu as pltpu


def _round_up(x, m):
    return ((x + m - 1) // m) * m


def _vmem_capacity_bytes():
    """Per-core VMEM capacity; conservative fallback = v7x (64 MiB per TensorCore)."""
    try:
        cap = getattr(pltpu.get_tpu_info(), "vmem_capacity_bytes", None)
        if cap:
            return int(cap)
    except Exception:
        pass
    return 64 * 1024 * 1024


def _plan_conv_tiling(m, kp, cout_p, itemsize=2):
    """Pick the output-row tile and scoped-VMEM limit so the pipelined working set fits.

    Working set per step = double-buffered patch tile + double-buffered y tile
    + (double-buffered, grid-invariant) weight block + tiny f32 stats rows.
    """
    cap = _vmem_capacity_bytes()
    weight_bytes = 2 * kp * cout_p * itemsize                    # 2 buffers (see TODO)
    budget = max(4 << 20, min(cap // 3, 32 << 20) - weight_bytes)
    per_row = 2 * itemsize * (kp + cout_p)                       # double-buffered rows
    tm = max(64, min(1024, (budget // per_row) // 64 * 64))
    tm = min(tm, _round_up(max(m, 1), 64))                       # don't over-pad tiny problems
    need = tm * per_row + weight_bytes + (1 << 20)
    vmem_limit = int(min(cap * 3 // 4, max(32 << 20, need + (8 << 20))))
    return tm, vmem_limit


# ------------------- fused LeakyReLU + tap-packed 4x4 stride-2 conv (+ BN partials) ----------

def _leaky_conv_kernel(x_ref, w_ref, y_ref, psum_ref, psq_ref, *,
                       apply_leaky, slope, compute_stats):
    """One grid step = `tm` output rows -> one aligned MXU matmul.

    x_ref   : (tm, Kp)        bf16  tap-packed input patches (K = 16*cin, zero padded)
    w_ref   : (Kp, cout_p)    bf16  tap-packed conv weights
    y_ref   : (tm, cout_p)          conv output rows
    psum_ref/psq_ref : (1, 1, cout_p) f32  per-step partial BN statistics
    """
    xp = x_ref[...]
    if apply_leaky:
        xf = xp.astype(jnp.float32)                       # LeakyReLU in f32 (no bf16 VPU on v5e)
        xp = jnp.where(xf >= 0.0, xf, slope * xf).astype(jnp.bfloat16)
    acc = jnp.dot(xp, w_ref[...], preferred_element_type=jnp.float32)   # (tm, cout_p) f32
    y_ref[...] = acc.astype(y_ref.dtype)

    if compute_stats:
        psum_ref[...] = jnp.sum(acc, axis=0, keepdims=True).reshape(psum_ref.shape)
        psq_ref[...] = jnp.sum(acc * acc, axis=0, keepdims=True).reshape(psq_ref.shape)
    else:
        psum_ref[...] = jnp.zeros_like(psum_ref)
        psq_ref[...] = jnp.zeros_like(psq_ref)


# ------------------------------------ tiled BatchNorm apply ----------------------------------

def _bn_apply_kernel(y_ref, scale_ref, shift_ref, o_ref):
    y = y_ref[...].astype(jnp.float32)
    o_ref[...] = (y * scale_ref[...] + shift_ref[...]).astype(o_ref.dtype)


# --------------------------------------- forward wrapper -------------------------------------

def encode_block_forward(x_nchw, weight, gamma, beta, *,
                         outermost=False, innermost=False,
                         slope=0.2, eps=1e-5, out_dtype=jnp.bfloat16,
                         row_tile=None):
    """Pallas forward of EncodeBlock. x_nchw: (N, outer_nc, H, W); weight: (inner_nc, outer_nc, 4, 4)."""
    cout, cin, kh, kw_ = weight.shape
    assert (kh, kw_) == (4, 4)
    n, cin_x, h, w = x_nchw.shape
    assert cin_x == cin and h % 2 == 0 and w % 2 == 0
    ho, wo = h // 2, w // 2
    m = n * ho * wo

    apply_leaky = not outermost
    apply_bn = not (outermost or innermost)

    k = 16 * cin
    kp = _round_up(k, 128)          # lane-dense contraction axis (no 128x channel padding of HBM input)
    cout_p = _round_up(cout, 128)   # lane-dense output channels: unmasked vst, full MXU N

    tm_auto, vmem_limit = _plan_conv_tiling(m, kp, cout_p)
    if row_tile is None:
        tm = tm_auto
    else:
        assert row_tile % 16 == 0
        tm = row_tile
    m_pad = _round_up(m, tm)        # padded rows are all-zero -> contribute 0 to BN partial sums
    num_steps = m_pad // tm

    # NCHW -> NHWC, zero pad spatially by 1 (Conv2d padding=1).  LeakyReLU(0) = 0, so the
    # fused in-kernel activation on already-padded patches is exact.
    x = jnp.transpose(x_nchw, (0, 2, 3, 1))
    xpad = jnp.pad(x, ((0, 0), (1, 1), (1, 1), (0, 0)))
    # Tap-packed patches: patches[n, i, j, (ki*4 + kj)*cin + ci] = xpad[n, 2i+ki, 2j+kj, ci].
    patches = jnp.concatenate(
        [xpad[:, ki:ki + 2 * ho:2, kj:kj + 2 * wo:2, :]
         for ki in range(4) for kj in range(4)],
        axis=-1).reshape(m, k).astype(jnp.bfloat16)
    patches = jnp.pad(patches, ((0, m_pad - m), (0, kp - k)))

    # weight (Cout, Cin, 4, 4) -> (16*Cin, Cout); row index = (ki*4 + kj)*cin + ci.
    w2d = jnp.transpose(weight, (2, 3, 1, 0)).reshape(k, cout).astype(jnp.bfloat16)
    w2d = jnp.pad(w2d, ((0, kp - k), (0, cout_p - cout)))

    y_dtype = jnp.bfloat16 if apply_bn else out_dtype
    conv_kernel = functools.partial(_leaky_conv_kernel, apply_leaky=apply_leaky,
                                    slope=slope, compute_stats=apply_bn)
    flops = 2 * m_pad * kp * cout_p
    bytes_accessed = 2 * (patches.size + w2d.size + m_pad * cout_p) + 8 * num_steps * cout_p

    y2d, psum, psq = pl.pallas_call(
        conv_kernel,
        out_shape=(
            jax.ShapeDtypeStruct((m_pad, cout_p), y_dtype),
            jax.ShapeDtypeStruct((num_steps, 1, cout_p), jnp.float32),
            jax.ShapeDtypeStruct((num_steps, 1, cout_p), jnp.float32),
        ),
        grid=(num_steps,),
        in_specs=[
            pl.BlockSpec((tm, kp), lambda i: (i, 0)),
            pl.BlockSpec((kp, cout_p), lambda i: (0, 0)),    # grid-invariant weights
        ],
        out_specs=(
            pl.BlockSpec((tm, cout_p), lambda i: (i, 0)),
            pl.BlockSpec((1, 1, cout_p), lambda i: (i, 0, 0)),
            pl.BlockSpec((1, 1, cout_p), lambda i: (i, 0, 0)),
        ),
        compiler_params=pltpu.CompilerParams(
            dimension_semantics=("parallel",),               # partial stats: no sequential axis
            vmem_limit_bytes=vmem_limit),
        cost_estimate=pl.CostEstimate(flops=flops, transcendentals=0,
                                      bytes_accessed=bytes_accessed),
    )(patches, w2d)

    if apply_bn:
        # Tiny XLA reduction of the per-step partials + scale/shift precompute (all f32).
        inv_n = 1.0 / float(m)                    # true element count: padded rows are exact zeros
        mean = jnp.sum(psum, axis=0) * inv_n      # (1, cout_p)
        var = jnp.maximum(jnp.sum(psq, axis=0) * inv_n - mean * mean, 0.0)   # biased variance
        gamma_p = jnp.pad(gamma.astype(jnp.float32).reshape(1, cout),
                          ((0, 0), (0, cout_p - cout)))
        beta_p = jnp.pad(beta.astype(jnp.float32).reshape(1, cout),
                         ((0, 0), (0, cout_p - cout)))
        scale = gamma_p * jax.lax.rsqrt(var + eps)
        shift = beta_p - mean * scale

        y2d = pl.pallas_call(
            _bn_apply_kernel,
            out_shape=jax.ShapeDtypeStruct((m_pad, cout_p), out_dtype),
            grid=(num_steps,),
            in_specs=[
                pl.BlockSpec((tm, cout_p), lambda i: (i, 0)),
                pl.BlockSpec((1, cout_p), lambda i: (0, 0)),
                pl.BlockSpec((1, cout_p), lambda i: (0, 0)),
            ],
            out_specs=pl.BlockSpec((tm, cout_p), lambda i: (i, 0)),
            compiler_params=pltpu.CompilerParams(
                dimension_semantics=("parallel",),
                vmem_limit_bytes=vmem_limit),
        )(y2d, scale, shift)

    # Slice row/channel padding off exactly once; back to NCHW.
    # TODO(synk): in a channels-last U-Net this transpose disappears; fusing it into the BN
    # kernel would make the stores lane-sparse (last dim wo < 128), so it stays in XLA.
    y = y2d[:m].reshape(n, ho, wo, cout_p)[..., :cout]
    return jnp.transpose(y, (0, 3, 1, 2))


# ---------------------------------------- pure-JAX reference ---------------------------------

def reference_forward(x, weight, gamma, beta, *, outermost=False, innermost=False,
                      slope=0.2, eps=1e-5):
    y = x if outermost else jnp.where(x >= 0, x, slope * x)
    y = jax.lax.conv_general_dilated(
        y, weight, window_strides=(2, 2), padding=((1, 1), (1, 1)),
        dimension_numbers=("NCHW", "OIHW", "NCHW"))
    if not (outermost or innermost):
        mean = jnp.mean(y, axis=(0, 2, 3), keepdims=True)
        var = jnp.mean(jnp.square(y - mean), axis=(0, 2, 3), keepdims=True)
        y = (y - mean) * jax.lax.rsqrt(var + eps)
        y = y * gamma.reshape(1, -1, 1, 1) + beta.reshape(1, -1, 1, 1)
    return y


# ----------------------------------------------- main ----------------------------------------

if __name__ == "__main__":
    batch, outer_nc, inner_nc, spatial = 2, 4, 8, 16

    key = jax.random.PRNGKey(0)
    kx, kw, kg, kb = jax.random.split(key, 4)
    x = jax.random.normal(kx, (batch, outer_nc, spatial, spatial), jnp.float32)
    weight = 0.05 * jax.random.normal(kw, (inner_nc, outer_nc, 4, 4), jnp.float32)
    gamma = 1.0 + 0.1 * jax.random.normal(kg, (inner_nc,), jnp.float32)
    beta = 0.1 * jax.random.normal(kb, (inner_nc,), jnp.float32)

    fwd = jax.jit(encode_block_forward,
                  static_argnames=("outermost", "innermost", "slope", "eps",
                                   "out_dtype", "row_tile"))

    configs = [
        {},                       # default: LeakyReLU -> conv -> BatchNorm
        {"innermost": True},      # LeakyReLU -> conv
        {"outermost": True},      # conv only
        {"row_tile": 64},         # force a multi-step row-tiled grid + partial-stats reduction
    ]
    for kwargs in configs:
        out = jax.block_until_ready(fwd(x, weight, gamma, beta, **kwargs))
        assert out.shape == (batch, inner_nc, spatial // 2, spatial // 2), out.shape
        out_f32 = out.astype(jnp.float32)
        assert bool(jnp.all(jnp.isfinite(out_f32)))
        ref_kwargs = {k: v for k, v in kwargs.items() if k in ("outermost", "innermost")}
        ref = reference_forward(x, weight, gamma, beta, **ref_kwargs)
        denom = float(jnp.std(ref)) + 1e-6
        err = float(jnp.max(jnp.abs(out_f32 - ref))) / denom
        assert err < 0.1, (kwargs, err)   # loose: bf16 data path with f32 accumulation

    print("KERNEL_OK")
</pallas_src>

<mosaic_0001>
module attributes {stable_mosaic.version = 11 : i64} {
  func.func @_leaky_conv_kernel(%arg0: i32, %arg1: memref<128x128xbf16, #tpu.memory_space<vmem>>, %arg2: memref<128x128xbf16, #tpu.memory_space<vmem>>, %arg3: memref<128x128xbf16, #tpu.memory_space<vmem>>, %arg4: memref<1x1x128xf32, #tpu.memory_space<vmem>>, %arg5: memref<1x1x128xf32, #tpu.memory_space<vmem>>) attributes {dimension_semantics = [#tpu.dimension_semantics<parallel>], iteration_bounds = array<i64: 1>, scalar_prefetch = 0 : i64, scratch_operands = 0 : i64, tpu.core_type = #tpu.core_type<tc>, window_params = [{transform_indices = @transform_0, window_bounds = array<i64: 128, 128>}, {pipeline_mode = #tpu.pipeline_mode<synchronous>, transform_indices = @transform_1, window_bounds = array<i64: 128, 128>}, {transform_indices = @transform_2, window_bounds = array<i64: 128, 128>}, {transform_indices = @transform_3, window_bounds = array<i64: 1, 1, 128>}, {transform_indices = @transform_4, window_bounds = array<i64: 1, 1, 128>}]} {
    %c0 = arith.constant 0 : index
    %c0_0 = arith.constant 0 : index
    %0 = vector.load %arg1[%c0, %c0_0] : memref<128x128xbf16, #tpu.memory_space<vmem>>, vector<128x128xbf16>
    %1 = arith.extf %0 : vector<128x128xbf16> to vector<128x128xf32>
    %cst = arith.constant 0.000000e+00 : f32
    %2 = vector.broadcast %cst : f32 to vector<128x128xf32>
    %3 = arith.cmpf oge, %1, %2 : vector<128x128xf32>
    %cst_1 = arith.constant 2.000000e-01 : f32
    %4 = vector.broadcast %cst_1 : f32 to vector<128x128xf32>
    %5 = arith.mulf %4, %1 : vector<128x128xf32>
    %6 = arith.select %3, %1, %5 : vector<128x128xi1>, vector<128x128xf32>
    %7 = arith.truncf %6 : vector<128x128xf32> to vector<128x128xbf16>
    %c0_2 = arith.constant 0 : index
    %c0_3 = arith.constant 0 : index
    %8 = vector.load %arg2[%c0_2, %c0_3] : memref<128x128xbf16, #tpu.memory_space<vmem>>, vector<128x128xbf16>
    %cst_4 = arith.constant dense<0.000000e+00> : vector<128x128xf32>
    %9 = tpu.matmul %7, %8, %cst_4 {dimension_numbers = #tpu.dot_dimension_numbers<[1], [0], [0], [1], [0, 0, 1, 1], [], []>} : vector<128x128xbf16>, vector<128x128xbf16>, vector<128x128xf32> -> vector<128x128xf32>
    %10 = arith.truncf %9 : vector<128x128xf32> to vector<128x128xbf16>
    %c0_5 = arith.constant 0 : index
    %c0_6 = arith.constant 0 : index
    %11 = vector.load %arg3[%c0_5, %c0_6] : memref<128x128xbf16, #tpu.memory_space<vmem>>, vector<128x128xbf16>
    tpu.vector_store %arg3[%c0_5, %c0_6], %10 {strides = array<i32>} : memref<128x128xbf16, #tpu.memory_space<vmem>>, vector<128x128xbf16>,
    %cst_7 = arith.constant dense<0.000000e+00> : vector<128xf32>
    %12 = vector.multi_reduction <add>, %9, %cst_7 [0] : vector<128x128xf32> to vector<128xf32>
    %13 = vector.shape_cast %12 : vector<128xf32> to vector<1x128xf32>
    %14 = vector.shape_cast %13 : vector<1x128xf32> to vector<1x1x128xf32>
    %c0_8 = arith.constant 0 : index
    %c0_9 = arith.constant 0 : index
    %c0_10 = arith.constant 0 : index
    %15 = vector.load %arg4[%c0_8, %c0_9, %c0_10] : memref<1x1x128xf32, #tpu.memory_space<vmem>>, vector<1x1x128xf32>
    tpu.vector_store %arg4[%c0_8, %c0_9, %c0_10], %14 {strides = array<i32>} : memref<1x1x128xf32, #tpu.memory_space<vmem>>, vector<1x1x128xf32>,
    %16 = arith.mulf %9, %9 : vector<128x128xf32>
    %cst_11 = arith.constant dense<0.000000e+00> : vector<128xf32>
    %17 = vector.multi_reduction <add>, %16, %cst_11 [0] : vector<128x128xf32> to vector<128xf32>
    %18 = vector.shape_cast %17 : vector<128xf32> to vector<1x128xf32>
    %19 = vector.shape_cast %18 : vector<1x128xf32> to vector<1x1x128xf32>
    %c0_12 = arith.constant 0 : index
    %c0_13 = arith.constant 0 : index
    %c0_14 = arith.constant 0 : index
    %20 = vector.load %arg5[%c0_12, %c0_13, %c0_14] : memref<1x1x128xf32, #tpu.memory_space<vmem>>, vector<1x1x128xf32>
    tpu.vector_store %arg5[%c0_12, %c0_13, %c0_14], %19 {strides = array<i32>} : memref<1x1x128xf32, #tpu.memory_space<vmem>>, vector<1x1x128xf32>,
    return
  }
  func.func @transform_0(%arg0: i32) -> (i32, i32) {
    %c0_i32 = arith.constant 0 : i32
    %c0_i32_0 = arith.constant 0 : i32
    return %arg0, %c0_i32 : i32, i32
  }
  func.func @transform_1(%arg0: i32) -> (i32, i32) {
    %c0_i32 = arith.constant 0 : i32
    %c0_i32_0 = arith.constant 0 : i32
    %c0_i32_1 = arith.constant 0 : i32
    return %c0_i32, %c0_i32_0 : i32, i32
  }
  func.func @transform_2(%arg0: i32) -> (i32, i32) {
    %c0_i32 = arith.constant 0 : i32
    %c0_i32_0 = arith.constant 0 : i32
    return %arg0, %c0_i32 : i32, i32
  }
  func.func @transform_3(%arg0: i32) -> (i32, i32, i32) {
    %c0_i32 = arith.constant 0 : i32
    %c0_i32_0 = arith.constant 0 : i32
    %c0_i32_1 = arith.constant 0 : i32
    return %arg0, %c0_i32, %c0_i32_0 : i32, i32, i32
  }
  func.func @transform_4(%arg0: i32) -> (i32, i32, i32) {
    %c0_i32 = arith.constant 0 : i32
    %c0_i32_0 = arith.constant 0 : i32
    %c0_i32_1 = arith.constant 0 : i32
    return %arg0, %c0_i32, %c0_i32_0 : i32, i32, i32
  }
}

module attributes {stable_mosaic.version = 11 : i64} {
  func.func @_bn_apply_kernel(%arg0: i32, %arg1: memref<128x128xbf16, #tpu.memory_space<vmem>>, %arg2: memref<1x128xf32, #tpu.memory_space<vmem>>, %arg3: memref<1x128xf32, #tpu.memory_space<vmem>>, %arg4: memref<128x128xbf16, #tpu.memory_space<vmem>>) attributes {dimension_semantics = [#tpu.dimension_semantics<parallel>], iteration_bounds = array<i64: 1>, scalar_prefetch = 0 : i64, scratch_operands = 0 : i64, tpu.core_type = #tpu.core_type<tc>, window_params = [{transform_indices = @transform_0, window_bounds = array<i64: 128, 128>}, {pipeline_mode = #tpu.pipeline_mode<synchronous>, transform_indices = @transform_1, window_bounds = array<i64: 1, 128>}, {pipeline_mode = #tpu.pipeline_mode<synchronous>, transform_indices = @transform_2, window_bounds = array<i64: 1, 128>}, {transform_indices = @transform_3, window_bounds = array<i64: 128, 128>}]} {
    %c0 = arith.constant 0 : index
    %c0_0 = arith.constant 0 : index
    %0 = vector.load %arg1[%c0, %c0_0] : memref<128x128xbf16, #tpu.memory_space<vmem>>, vector<128x128xbf16>
    %1 = arith.extf %0 : vector<128x128xbf16> to vector<128x128xf32>
    %c0_1 = arith.constant 0 : index
    %c0_2 = arith.constant 0 : index
    %2 = vector.load %arg2[%c0_1, %c0_2] : memref<1x128xf32, #tpu.memory_space<vmem>>, vector<1x128xf32>
    %3 = vector.broadcast %2 : vector<1x128xf32> to vector<128x128xf32>
    %4 = arith.mulf %1, %3 : vector<128x128xf32>
    %c0_3 = arith.constant 0 : index
    %c0_4 = arith.constant 0 : index
    %5 = vector.load %arg3[%c0_3, %c0_4] : memref<1x128xf32, #tpu.memory_space<vmem>>, vector<1x128xf32>
    %6 = vector.broadcast %5 : vector<1x128xf32> to vector<128x128xf32>
    %7 = arith.addf %4, %6 : vector<128x128xf32>
    %8 = arith.truncf %7 : vector<128x128xf32> to vector<128x128xbf16>
    %c0_5 = arith.constant 0 : index
    %c0_6 = arith.constant 0 : index
    %9 = vector.load %arg4[%c0_5, %c0_6] : memref<128x128xbf16, #tpu.memory_space<vmem>>, vector<128x128xbf16>
    tpu.vector_store %arg4[%c0_5, %c0_6], %8 {strides = array<i32>} : memref<128x128xbf16, #tpu.memory_space<vmem>>, vector<128x128xbf16>,
    return
  }
  func.func @transform_0(%arg0: i32) -> (i32, i32) {
    %c0_i32 = arith.constant 0 : i32
    %c0_i32_0 = arith.constant 0 : i32
    return %arg0, %c0_i32 : i32, i32
  }
  func.func @transform_1(%arg0: i32) -> (i32, i32) {
    %c0_i32 = arith.constant 0 : i32
    %c0_i32_0 = arith.constant 0 : i32
    %c0_i32_1 = arith.constant 0 : i32
    return %c0_i32, %c0_i32_0 : i32, i32
  }
  func.func @transform_2(%arg0: i32) -> (i32, i32) {
    %c0_i32 = arith.constant 0 : i32
    %c0_i32_0 = arith.constant 0 : i32
    %c0_i32_1 = arith.constant 0 : i32
    return %c0_i32, %c0_i32_0 : i32, i32
  }
  func.func @transform_3(%arg0: i32) -> (i32, i32) {
    %c0_i32 = arith.constant 0 : i32
    %c0_i32_0 = arith.constant 0 : i32
    return %arg0, %c0_i32 : i32, i32
  }
}

</mosaic_0001>

<bundles_post_ra>
// kernel: encode_block_forward.3
= control target key start
LH: loop header
LB: loop body
LE: loop exit
PB: predicated region body
PF: predicated region fallthrough
CT: control target
= control target key end

     0   :  { %s370_s0 = inlined_call_operand.vmem [shape: bf16[128,128], index: 0, kind: input, shape index: {}]   ;;  %s371_s1 = inlined_call_operand.vmem [shape: f32[1,128], index: 1, kind: input, shape index: {}]   ;;  %s372_s2 = inlined_call_operand.vmem [shape: f32[1,128], index: 2, kind: input, shape index: {}]   ;;  %s373_s3 = inlined_call_operand.vmem [shape: bf16[128,128], index: 3, kind: output, shape index: {}]  }
   0x1   :  { %v211_v0 = vld [vmem:[%s370_s0] sm:$0xff]   ;;  %v282_v4 = vld [vmem:[%s370_s0 + $0x8] sm:$0xff]   ;;  %v283_v5 = vld [vmem:[%s370_s0 + $0x10] sm:$0xff]  }
   0x2   :  { %v176_v1 = vld [vmem:[%s371_s1] ss:$0 sm:$0xff]  ;;  %v212_v2 = vunpack.c.l.bf16 %v211_v0  ;;  %v213_v3 = vunpack.c.h.bf16 %v211_v0  ;;  %v284_v6 = vld [vmem:[%s370_s0 + $0x18] sm:$0xff]   ;;  %v216_v8 = vunpack.c.l.bf16 %v282_v4  ;;  %v217_v9 = vunpack.c.h.bf16 %v282_v4  ;;  %v286_v25 = vld [vmem:[%s370_s0 + $0x28] sm:$0xff]  }
   0x3   :  { %v177_v7 = vld [vmem:[%s372_s2] ss:$0 sm:$0xff]  ;;  %v220_v10 = vunpack.c.l.bf16 %v283_v5  ;;  %v221_v11 = vunpack.c.h.bf16 %v283_v5  ;;  %v224_v14 = vunpack.c.l.bf16 %v284_v6  ;;  %v225_v15 = vunpack.c.h.bf16 %v284_v6  ;;  %v287_v30 = vld [vmem:[%s370_s0 + $0x30] sm:$0xff]   ;;  %v288_v35 = vld [vmem:[%s370_s0 + $0x38] sm:$0xff]  }
   0x4   :  { %v53_v12 = vmul.f32 %v212_v2, %v176_v1  ;;  %v54_v13 = vmul.f32 %v213_v3, %v176_v1  ;;  %v55_v16 = vmul.f32 %v216_v8, %v176_v1  ;;  %v56_v17 = vmul.f32 %v217_v9, %v176_v1  ;;  %v285_v20 = vld [vmem:[%s370_s0 + $0x20] sm:$0xff]  }
   0x5   :  { %v57_v18 = vmul.f32 %v220_v10, %v176_v1  ;;  %v58_v19 = vmul.f32 %v221_v11, %v176_v1  ;;  %v59_v23 = vmul.f32 %v224_v14, %v176_v1  ;;  %v60_v24 = vmul.f32 %v225_v15, %v176_v1 }
   0x6   :  { %v76_v21 = vadd.f32 %v177_v7, %v53_v12  ;;  %v77_v22 = vadd.f32 %v177_v7, %v54_v13  ;;  %v78_v26 = vadd.f32 %v177_v7, %v55_v16  ;;  %v79_v27 = vadd.f32 %v177_v7, %v56_v17 }
   0x7   :  { %v80_v28 = vadd.f32 %v177_v7, %v57_v18  ;;  %v81_v29 = vadd.f32 %v177_v7, %v58_v19  ;;  %v82_v32 = vadd.f32 %v177_v7, %v59_v23  ;;  %v83_v33 = vadd.f32 %v177_v7, %v60_v24 }
   0x8   :  { %v245_v31 = vpack.c.bf16 %v77_v22, %v76_v21  ;;  %v228_v34 = vunpack.c.l.bf16 %v285_v20  ;;  %v250_v36 = vpack.c.bf16 %v79_v27, %v78_v26  ;;  %v229_v38 = vunpack.c.h.bf16 %v285_v20 }
   0x9   :  { %v255_v37 = vpack.c.bf16 %v81_v29, %v80_v28  ;;  %v232_v39 = vunpack.c.l.bf16 %v286_v25  ;;  %v260_v40 = vpack.c.bf16 %v83_v33, %v82_v32  ;;  %v233_v42 = vunpack.c.h.bf16 %v286_v25 }
   0xa   :  { %246 = vst [vmem:[%s373_s3] sm:$0xff] %v245_v31   ;;  %v61_v41 = vmul.f32 %v228_v34, %v176_v1  ;;  %v236_v43 = vunpack.c.l.bf16 %v287_v30  ;;  %289 = vst [vmem:[%s373_s3 + $0x8] sm:$0xff] %v250_v36   ;;  %v62_v44 = vmul.f32 %v229_v38, %v176_v1  ;;  %v237_v46 = vunpack.c.h.bf16 %v287_v30 }
   0xb   :  { %290 = vst [vmem:[%s373_s3 + $0x10] sm:$0xff] %v255_v37   ;;  %v63_v45 = vmul.f32 %v232_v39, %v176_v1  ;;  %v240_v47 = vunpack.c.l.bf16 %v288_v35  ;;  %291 = vst [vmem:[%s373_s3 + $0x18] sm:$0xff] %v260_v40   ;;  %v64_v49 = vmul.f32 %v233_v42, %v176_v1  ;;  %v241_v51 = vunpack.c.h.bf16 %v288_v35 }
   0xc   :  { %v84_v48 = vadd.f32 %v177_v7, %v61_v41  ;;  %v65_v50 = vmul.f32 %v236_v43, %v176_v1  ;;  %v85_v52 = vadd.f32 %v177_v7, %v62_v44  ;;  %v66_v54 = vmul.f32 %v237_v46, %v176_v1 }
   0xd   :  { %v86_v53 = vadd.f32 %v177_v7, %v63_v45  ;;  %v67_v55 = vmul.f32 %v240_v47, %v176_v1  ;;  %v87_v56 = vadd.f32 %v177_v7, %v64_v49  ;;  %v68_v58 = vmul.f32 %v241_v51, %v176_v1 }
   0xe   :  { %v88_v57 = vadd.f32 %v177_v7, %v65_v50  ;;  %v265_v59 = vpack.c.bf16 %v85_v52, %v84_v48  ;;  %v89_v60 = vadd.f32 %v177_v7, %v66_v54 }
   0xf   :  { %v90_v61 = vadd.f32 %v177_v7, %v67_v55  ;;  %v270_v62 = vpack.c.bf16 %v87_v56, %v86_v53  ;;  %v91_v63 = vadd.f32 %v177_v7, %v68_v58 }
  0x10   :  { %292 = vst [vmem:[%s373_s3 + $0x20] sm:$0xff] %v265_v59   ;;  %v275_v0 = vpack.c.bf16 %v89_v60, %v88_v57 }
  0x11   :  { %293 = vst [vmem:[%s373_s3 + $0x28] sm:$0xff] %v270_v62   ;;  %v280_v2 = vpack.c.bf16 %v91_v63, %v90_v61 }
  0x12   :  { %294 = vst [vmem:[%s373_s3 + $0x30] sm:$0xff] %v275_v0  }
  0x13   :  { %295 = vst [vmem:[%s373_s3 + $0x38] sm:$0xff] %v280_v2  }

// kernel: encode_block_forward.2
= control target key start
LH: loop header
LB: loop body
LE: loop exit
PB: predicated region body
PF: predicated region fallthrough
CT: control target
= control target key end

     0   :  { %s722_s1 = inlined_call_operand.vmem [shape: bf16[128,128], index: 1, kind: input, shape index: {}]   ;;  %s723_s0 = inlined_call_operand.vmem [shape: bf16[128,128], index: 0, kind: input, shape index: {}]   ;;  %s724_s2 = inlined_call_operand.vmem [shape: bf16[128,128], index: 2, kind: output, shape index: {0}]   ;;  %s725_s3 = inlined_call_operand.vmem [shape: f32[1,1,128], index: 3, kind: output, shape index: {1}]   ;;  %s726_s4 = inlined_call_operand.vmem [shape: f32[1,1,128], index: 4, kind: output, shape index: {2}]  }
   0x1   :  { %v606_v0 = vld [vmem:[%s722_s1] sm:$0xff]   ;;  %v607_v1 = vld [vmem:[%s722_s1 + $0x8] sm:$0xff]   ;;  %v608_v2 = vld [vmem:[%s722_s1 + $0x10] sm:$0xff]  }
   0x2   :  { %558 = vmatprep.subr.bf16.mxu0 %v606_v0  ;;  %590 = vmatprep.subr.bf16.mxu1 %v606_v0  ;;  %v609_v3 = vld [vmem:[%s722_s1 + $0x18] sm:$0xff]   ;;  %v457_v4 = vld [vmem:[%s723_s0] sm:$0xff]   ;;  %v528_v12 = vld [vmem:[%s723_s0 + $0x8] sm:$0xff]  }
   0x3   :  { %559 = vmatpush3.bf16.msra.mxu0 %v606_v0  ;;  %598 = vmatpush3.bf16.msra.mxu1 %v606_v0  ;;  %v458_v5 = vunpack.c.l.bf16 %v457_v4  ;;  %v459_v6 = vunpack.c.h.bf16 %v457_v4  ;;  %v610_v9 = vld [vmem:[%s722_s1 + $0x20] sm:$0xff]   ;;  %v529_v15 = vld [vmem:[%s723_s0 + $0x10] sm:$0xff]   ;;  %v532_v16 = vld [vmem:[%s723_s0 + $0x28] sm:$0xff]   ;;  %v462_v18 = vunpack.c.l.bf16 %v528_v12  ;;  %v463_v19 = vunpack.c.h.bf16 %v528_v12 }
   0x4   :  { %560 = vmatprep.subr.bf16.mxu0 %v607_v1  ;;  %591 = vmatprep.subr.bf16.mxu1 %v607_v1  ;;  %v531_v13 = vld [vmem:[%s723_s0 + $0x20] sm:$0xff]   ;;  %v611_v17 = vld [vmem:[%s722_s1 + $0x28] sm:$0xff]   ;;  %v466_v22 = vunpack.c.l.bf16 %v529_v15  ;;  %v467_v23 = vunpack.c.h.bf16 %v529_v15  ;;  %v478_v24 = vunpack.c.l.bf16 %v532_v16  ;;  %v533_v25 = vld [vmem:[%s723_s0 + $0x30] sm:$0xff]   ;;  %v479_v28 = vunpack.c.h.bf16 %v532_v16 }
   0x5   :  { %vm47_vm0 = vcmp.ge.f32.partialorder %v458_v5, 0.0  ;;  %vm48_vm1 = vcmp.ge.f32.partialorder %v459_v6, 0.0  ;;  %v63_v7 = vmul.f32 0.2, %v458_v5  ;;  %v64_v8 = vmul.f32 0.2, %v459_v6 }
   0x6   :  { %v474_v20 = vunpack.c.l.bf16 %v531_v13  ;;  %v475_v21 = vunpack.c.h.bf16 %v531_v13  ;;  %v612_v29 = vld [vmem:[%s722_s1 + $0x30] sm:$0xff]   ;;  %vm49_vm4 = vcmp.ge.f32.partialorder %v462_v18, 0.0  ;;  %vm50_vm5 = vcmp.ge.f32.partialorder %v463_v19, 0.0  ;;  %v530_v31 = vld [vmem:[%s723_s0 + $0x18] sm:$0xff]  }
   0x7   :  { %561 = vmatpush3.bf16.msra.mxu0 %v607_v1  ;;  %599 = vmatpush3.bf16.msra.mxu1 %v607_v1  ;;  %v79_v10 = vsel %vm47_vm0, %v458_v5, %v63_v7  ;;  %v80_v11 = vsel %vm48_vm1, %v459_v6, %v64_v8  ;;  %v65_v30 = vmul.f32 0.2, %v462_v18  ;;  %v482_v34 = vunpack.c.l.bf16 %v533_v25  ;;  %v613_v36 = vld [vmem:[%s722_s1 + $0x38] sm:$0xff]  }
   0x8   :  { %562 = vmatprep.subr.bf16.mxu0 %v608_v2  ;;  %592 = vmatprep.subr.bf16.mxu1 %v608_v2  ;;  %v95_v14 = vpack.c.bf16 %v80_v11, %v79_v10  ;;  %vm55_vm2 = vcmp.ge.f32.partialorder %v474_v20, 0.0  ;;  %vm56_vm3 = vcmp.ge.f32.partialorder %v475_v21, 0.0  ;;  %v71_v26 = vmul.f32 0.2, %v474_v20  ;;  %v534_v40 = vld [vmem:[%s723_s0 + $0x38] sm:$0xff]  }
   0x9   :  { %v72_v27 = vmul.f32 0.2, %v475_v21  ;;  %v483_v35 = vunpack.c.h.bf16 %v533_v25  ;;  %v66_v37 = vmul.f32 0.2, %v463_v19  ;;  %vm51_vm6 = vcmp.ge.f32.partialorder %v466_v22, 0.0 }
   0xa   :  { %574 = vmatprep.mubr.bf16.mxu0 %v95_v14  ;;  %v87_v32 = vsel %vm55_vm2, %v474_v20, %v71_v26  ;;  %v67_v38 = vmul.f32 0.2, %v466_v22  ;;  %v68_v41 = vmul.f32 0.2, %v467_v23  ;;  %v73_v42 = vmul.f32 0.2, %v478_v24 }
   0xb   :  { %563 = vmatpush3.bf16.msra.mxu0 %v608_v2  ;;  %600 = vmatpush3.bf16.msra.mxu1 %v608_v2  ;;  %v88_v33 = vsel %vm56_vm3, %v475_v21, %v72_v27  ;;  %v74_v43 = vmul.f32 0.2, %v479_v28  ;;  %vm57_vm7 = vcmp.ge.f32.partialorder %v478_v24, 0.0  ;;  %vm58_vm8 = vcmp.ge.f32.partialorder %v479_v28, 0.0 }
   0xc   :  { %564 = vmatprep.subr.bf16.mxu0 %v609_v3  ;;  %593 = vmatprep.subr.bf16.mxu1 %v609_v3  ;;  %v99_v39 = vpack.c.bf16 %v88_v33, %v87_v32  ;;  %v75_v44 = vmul.f32 0.2, %v482_v34  ;;  %v76_v45 = vmul.f32 0.2, %v483_v35  ;;  %vm52_vm9 = vcmp.ge.f32.partialorder %v467_v23, 0.0 }
   0xd   :  { %v470_v46 = vunpack.c.l.bf16 %v530_v31  ;;  %vm59_vm10 = vcmp.ge.f32.partialorder %v482_v34, 0.0  ;;  %vm60_vm11 = vcmp.ge.f32.partialorder %v483_v35, 0.0  ;;  %v81_v47 = vsel %vm49_vm4, %v462_v18, %v65_v30 }
   0xe   :  { %582 = vmatprep.mubr.bf16.mxu1 %v99_v39  ;;  %v82_v48 = vsel %vm50_vm5, %v463_v19, %v66_v37  ;;  %v83_v49 = vsel %vm51_vm6, %v466_v22, %v67_v38  ;;  %v471_v50 = vunpack.c.h.bf16 %v530_v31  ;;  %v89_v51 = vsel %vm57_vm7, %v478_v24, %v73_v42 }
   0xf   :  { %565 = vmatpush3.bf16.msra.mxu0 %v609_v3  ;;  %601 = vmatpush3.bf16.msra.mxu1 %v609_v3  ;;  %v90_v52 = vsel %vm58_vm8, %v479_v28, %v74_v43  ;;  %v486_v53 = vunpack.c.l.bf16 %v534_v40  ;;  %v487_v54 = vunpack.c.h.bf16 %v534_v40  ;;  %v84_v55 = vsel %vm52_vm9, %v467_v23, %v68_v41 }
  0x10   :  { %566 = vmatprep.subr.bf16.mxu0 %v610_v9  ;;  %594 = vmatprep.subr.bf16.mxu1 %v610_v9  ;;  %v91_v56 = vsel %vm59_vm10, %v482_v34, %v75_v44  ;;  %v92_v57 = vsel %vm60_vm11, %v483_v35, %v76_v45  ;;  %v96_v58 = vpack.c.bf16 %v82_v48, %v81_v47  ;;  %vm53_vm12 = vcmp.ge.f32.partialorder %v470_v46, 0.0 }
  0x11   :  { %v69_v59 = vmul.f32 0.2, %v470_v46  ;;  %v70_v60 = vmul.f32 0.2, %v471_v50  ;;  %v100_v61 = vpack.c.bf16 %v90_v52, %v89_v51  ;;  %v97_v62 = vpack.c.bf16 %v84_v55, %v83_v49 }
  0x12   :  { %v101_v63 = vpack.c.bf16 %v92_v57, %v91_v56  ;;  %v77_v0 = vmul.f32 0.2, %v486_v53  ;;  %v78_v1 = vmul.f32 0.2, %v487_v54  ;;  %vm54_vm13 = vcmp.ge.f32.partialorder %v471_v50, 0.0 }
  0x13   :  { %567 = vmatpush3.bf16.msra.mxu0 %v610_v9  ;;  %602 = vmatpush3.bf16.msra.mxu1 %v610_v9  ;;  %vm61_vm14 = vcmp.ge.f32.partialorder %v486_v53, 0.0  ;;  %vm62_vm15 = vcmp.ge.f32.partialorder %v487_v54, 0.0  ;;  %v85_v2 = vsel %vm53_vm12, %v470_v46, %v69_v59  ;;  %v86_v3 = vsel %vm54_vm13, %v471_v50, %v70_v60 }
  0x14   :  { %568 = vmatprep.subr.bf16.mxu0 %v611_v17  ;;  %595 = vmatprep.subr.bf16.mxu1 %v611_v17  ;;  %v93_v4 = vsel %vm61_vm14, %v486_v53, %v77_v0  ;;  %v94_v5 = vsel %vm62_vm15, %v487_v54, %v78_v1  ;;  %v98_v6 = vpack.c.bf16 %v86_v3, %v85_v2 }
  0x15   :  { %v102_v7 = vpack.c.bf16 %v94_v5, %v93_v4 }
  0x17   :  { %569 = vmatpush3.bf16.msra.mxu0 %v611_v17  ;;  %603 = vmatpush3.bf16.msra.mxu1 %v611_v17 }
  0x18   :  { %570 = vmatprep.subr.bf16.mxu0 %v612_v29  ;;  %596 = vmatprep.subr.bf16.mxu1 %v612_v29 }
  0x1b   :  { %571 = vmatpush3.bf16.msra.mxu0 %v612_v29  ;;  %604 = vmatpush3.bf16.msra.mxu1 %v612_v29 }
  0x1c   :  { %572 = vmatprep.subr.bf16.mxu0 %v613_v36  ;;  %597 = vmatprep.subr.bf16.mxu1 %v613_v36 }
  0x1f   :  { %573 = vmatpush3.bf16.msra.mxu0 %v613_v36  ;;  %605 = vmatpush3.bf16.msra.mxu1 %v613_v36 }
  0x22   :  { %575 = vmatmul.mubr.bf16.vlgmr.msra.gmra.mrb[0].mxu0 %v96_v58  ;;  %583 = vmatmul.mubr.bf16.vlgmr.msra.gmra.mrb[0].mxu1 %v100_v61 }
  0x23   :  { %578 = vmatprep.mubr.bf16.mxu0 %v97_v62  ;;  %586 = vmatprep.mubr.bf16.mxu1 %v101_v63 }
  0x2a   :  { %579 = vmatmul.mubr.bf16.gmra.mrb[4].mxu0 %v98_v6  ;;  %587 = vmatmul.mubr.bf16.gmra.mrb[4].mxu1 %v102_v7 }
  0xf5   :  { %v576_v8 = vpop.f32.mrb[0].mxu0  ;;  %v584_v9 = vpop.f32.mrb[0].mxu1 }
  0xf6   :  { %v201_v10 = vpop.f32.mrb[1].mxu0  ;;  %v233_v11 = vpop.f32.mrb[1].mxu1  ;;  %v368_v23 = vmul.f32 %v576_v8, %v576_v8  ;;  %v376_v59 = vmul.f32 %v584_v9, %v584_v9 }
  0xf7   :  { %v577_v12 = vpop.f32.mrb[2].mxu0  ;;  %v585_v13 = vpop.f32.mrb[2].mxu1  ;;  %v366_v14 = vmul.f32 %v201_v10, %v201_v10  ;;  %v374_v53 = vmul.f32 %v233_v11, %v233_v11 }
  0xf8   :  { %v496_v15 = vpack.c.bf16 %v577_v12, %v576_v8  ;;  %v204_v16 = vpop.f32.mrb[3].mxu0  ;;  %v516_v17 = vpack.c.bf16 %v585_v13, %v584_v9  ;;  %v236_v18 = vpop.f32.mrb[3].mxu1  ;;  %v369_v26 = vmul.f32 %v577_v12, %v577_v12  ;;  %v377_v62 = vmul.f32 %v585_v13, %v585_v13 }
  0xf9   :  { %v491_v19 = vpack.c.bf16 %v204_v16, %v201_v10  ;;  %v344_v20 = vadd.f32 %v204_v16, %v201_v10  ;;  %v367_v21 = vmul.f32 %v204_v16, %v204_v16  ;;  %v511_v22 = vpack.c.bf16 %v236_v18, %v233_v11 }
  0xfa   :  { %535 = vst [vmem:[%s724_s2 + $0x8] sm:$0xff] %v496_v15   ;;  %539 = vst [vmem:[%s724_s2 + $0x28] sm:$0xff] %v516_v17   ;;  %v375_v58 = vmul.f32 %v236_v18, %v236_v18 }
  0xfb   :  { %492 = vst [vmem:[%s724_s2] sm:$0xff] %v491_v19   ;;  %v345_v24 = vadd.f32 %v576_v8, %v344_v20  ;;  %v382_v25 = vadd.f32 %v367_v21, %v366_v14  ;;  %538 = vst [vmem:[%s724_s2 + $0x20] sm:$0xff] %v511_v22  }
  0xfd   :  { %v383_v27 = vadd.f32 %v382_v25, %v368_v23  ;;  %v580_v28 = vpop.f32.mrb[4].mxu0  ;;  %v346_v29 = vadd.f32 %v577_v12, %v345_v24  ;;  %v588_v30 = vpop.f32.mrb[4].mxu1 }
  0xfe   :  { %v217_v31 = vpop.f32.mrb[5].mxu0  ;;  %v249_v32 = vpop.f32.mrb[5].mxu1  ;;  %v372_v47 = vmul.f32 %v580_v28, %v580_v28  ;;  %v380_v7 = vmul.f32 %v588_v30, %v588_v30 }
  0xff   :  { %v347_v33 = vadd.f32 %v346_v29, %v217_v31  ;;  %v370_v34 = vmul.f32 %v217_v31, %v217_v31  ;;  %v384_v35 = vadd.f32 %v383_v27, %v369_v26  ;;  %v581_v36 = vpop.f32.mrb[6].mxu0  ;;  %v589_v37 = vpop.f32.mrb[6].mxu1  ;;  %v378_v1 = vmul.f32 %v249_v32, %v249_v32 }
 0x100   :  { %v506_v38 = vpack.c.bf16 %v581_v36, %v580_v28  ;;  %v220_v39 = vpop.f32.mrb[7].mxu0  ;;  %v526_v40 = vpack.c.bf16 %v589_v37, %v588_v30  ;;  %v252_v41 = vpop.f32.mrb[7].mxu1  ;;  %v373_v50 = vmul.f32 %v581_v36, %v581_v36 }
 0x101   :  { %v385_v42 = vadd.f32 %v384_v35, %v370_v34  ;;  %v501_v43 = vpack.c.bf16 %v220_v39, %v217_v31  ;;  %v348_v44 = vadd.f32 %v347_v33, %v220_v39  ;;  %v371_v45 = vmul.f32 %v220_v39, %v220_v39 }
 0x102   :  { %537 = vst [vmem:[%s724_s2 + $0x18] sm:$0xff] %v506_v38   ;;  %541 = vst [vmem:[%s724_s2 + $0x38] sm:$0xff] %v526_v40   ;;  %v521_v46 = vpack.c.bf16 %v252_v41, %v249_v32  ;;  %v379_v6 = vmul.f32 %v252_v41, %v252_v41 }
 0x103   :  { %536 = vst [vmem:[%s724_s2 + $0x10] sm:$0xff] %v501_v43   ;;  %v349_v48 = vadd.f32 %v580_v28, %v348_v44  ;;  %v386_v49 = vadd.f32 %v385_v42, %v371_v45 }
 0x104   :  { %540 = vst [vmem:[%s724_s2 + $0x30] sm:$0xff] %v521_v46  }
 0x105   :  { %v387_v51 = vadd.f32 %v386_v49, %v372_v47  ;;  %v350_v52 = vadd.f32 %v581_v36, %v349_v48 }
 0x107   :  { %v351_v54 = vadd.f32 %v350_v52, %v233_v11  ;;  %v388_v55 = vadd.f32 %v387_v51, %v373_v50  ;;  %v381_v11 = vmul.f32 %v589_v37, %v589_v37 }
 0x109   :  { %v389_v56 = vadd.f32 %v388_v55, %v374_v53  ;;  %v352_v57 = vadd.f32 %v351_v54, %v236_v18 }
 0x10b   :  { %v353_v60 = vadd.f32 %v584_v9, %v352_v57  ;;  %v390_v61 = vadd.f32 %v389_v56, %v375_v58 }
 0x10d   :  { %v391_v63 = vadd.f32 %v390_v61, %v376_v59  ;;  %v354_v0 = vadd.f32 %v585_v13, %v353_v60 }
 0x10f   :  { %v355_v2 = vadd.f32 %v354_v0, %v249_v32  ;;  %v392_v3 = vadd.f32 %v391_v63, %v377_v62 }
 0x111   :  { %v393_v4 = vadd.f32 %v392_v3, %v378_v1  ;;  %v356_v5 = vadd.f32 %v355_v2, %v252_v41 }
 0x113   :  { %v357_v8 = vadd.f32 %v588_v30, %v356_v5  ;;  %v394_v10 = vadd.f32 %v393_v4, %v379_v6 }
 0x115   :  { %v358_v12 = vadd.f32 %v589_v37, %v357_v8  ;;  %v395_v14 = vadd.f32 %v394_v10, %v380_v7 }
 0x117   :  { %v359_v15 = vrot.slane %v358_v12, 4  ;;  %v396_v16 = vadd.f32 %v395_v14, %v381_v11 }
 0x119   :  { %v360_v17 = vadd.f32 %v359_v15, %v358_v12  ;;  %v397_v9 = vrot.slane %v396_v16, 4 }
 0x11b   :  { %v361_v18 = vrot.slane %v360_v17, 2  ;;  %v398_v19 = vadd.f32 %v397_v9, %v396_v16 }
 0x11d   :  { %v362_v20 = vadd.f32 %v361_v18, %v360_v17  ;;  %v399_v13 = vrot.slane %v398_v19, 2 }
 0x11f   :  { %v363_v21 = vrot.slane %v362_v20, 1  ;;  %v400_v22 = vadd.f32 %v399_v13, %v398_v19 }
 0x121   :  { %v364_v23 = vadd.f32 %v363_v21, %v362_v20  ;;  %v401_v24 = vrot.slane %v400_v22, 1 }
 0x123   :  { %365 = vst [vmem:[%s725_s3] sm:$0x1] %v364_v23  ;;  %v402_v25 = vadd.f32 %v401_v24, %v400_v22 }
 0x125   :  { %403 = vst [vmem:[%s726_s4] sm:$0x1] %v402_v25 }

</bundles_post_ra>
